<compile_context>
chip_gen: v7x
topology: tpu7x:2x2x1
jax: 0.10.0
libtpu: 0.0.40
codegen_flags: <defaults>
</compile_context>

<pallas_src>
import math

import jax
import jax.numpy as jnp
from jax.experimental import pallas as pl
from jax.experimental.pallas import tpu as pltpu

_BN_EPS = 1e-5
_LANES = 128


def _round_up(n, m):
    return (n + m - 1) // m * m


# ----------------------------------------------------------------------------
# Fused kernel (built per static configuration)
# ----------------------------------------------------------------------------
def _make_fused_kernel(batch_true, batch_pad, e_pad, block_pad_dims, compute_dtype):
    """Kernel arg order:
         x_ref,
         (w_ref, gamma_ref, beta_ref) * n_blocks,   # w already (in_pad, o_pad)
         wf_ref, bf_ref,                            # final Linear tile (N-tiled)
         out_ref,                                   # (B_pad, TN) output tile
         buf_ref                                    # VMEM scratch (B_pad, total_pad)
    """
    n = len(block_pad_dims)
    inv_b = 1.0 / float(batch_true)

    def kernel(x_ref, *args):
        block_refs = args[: 3 * n]
        wf_ref = args[3 * n]
        bf_ref = args[3 * n + 1]
        out_ref = args[3 * n + 2]
        buf_ref = args[3 * n + 3]

        # Residual stack runs once; its result lives in the persistent scratch.
        @pl.when(pl.program_id(0) == 0)
        def _residual_stack():
            x = x_ref[...]                                # (B_pad, e_pad), pad rows/cols zero
            buf_ref[:, :e_pad] = x

            if batch_pad > batch_true:
                row_ids = jax.lax.broadcasted_iota(jnp.int32, (batch_pad, 1), 0)
                row_mask = (row_ids < batch_true).astype(jnp.float32)
            else:
                row_mask = None

            off = e_pad
            for k in range(n):
                w_ref = block_refs[3 * k]
                g_ref = block_refs[3 * k + 1]
                be_ref = block_refs[3 * k + 2]
                o_pad = block_pad_dims[k]

                xk = x if k == 0 else buf_ref[:, :off]    # lane-aligned slice

                # Linear (fc bias dropped: cancels exactly under batch-mean BN).
                h = jnp.dot(xk.astype(compute_dtype), w_ref[...],
                            preferred_element_type=jnp.float32)   # (B_pad, o_pad) f32

                # Single-pass BatchNorm stats over the TRUE batch rows: pad rows
                # of xk (hence of h) are exactly zero, so they contribute zero to
                # both sums; divide by the true batch size.
                mean = jnp.sum(h, axis=0, keepdims=True) * inv_b
                ex2 = jnp.sum(h * h, axis=0, keepdims=True) * inv_b
                var = jnp.maximum(ex2 - mean * mean, 0.0)
                scale = g_ref[...] * jax.lax.rsqrt(var + _BN_EPS)   # (1, o_pad)
                shift = be_ref[...] - mean * scale                  # (1, o_pad)

                act = jnp.maximum(h * scale + shift, 0.0)
                if row_mask is not None:
                    act = act * row_mask    # keep pad rows exactly zero for later blocks
                buf_ref[:, off:off + o_pad] = act          # lane-dense append
                off += o_pad

        # Final Linear over the full concatenated activation, one N tile per step.
        out_ref[...] = (
            jnp.dot(buf_ref[...].astype(compute_dtype), wf_ref[...],
                    preferred_element_type=jnp.float32)
            + bf_ref[...]
        )

    return kernel


# ----------------------------------------------------------------------------
# Parameter init (PyTorch layout) and kernel-layout preparation
# ----------------------------------------------------------------------------
def init_generator_params(key, embedding_dim, generator_dim, data_dim):
    """PyTorch layout: Linear W (out, in), b (out,); BN gamma/beta (out,)."""
    params = {"residuals": []}
    dim = embedding_dim
    for item in generator_dim:
        key, kw, kb = jax.random.split(key, 3)
        bound = 1.0 / math.sqrt(dim)
        params["residuals"].append({
            "w": jax.random.uniform(kw, (item, dim), jnp.float32, -bound, bound),
            "b": jax.random.uniform(kb, (item,), jnp.float32, -bound, bound),
            "gamma": jnp.ones((item,), jnp.float32),
            "beta": jnp.zeros((item,), jnp.float32),
        })
        dim += item
    key, kw, kb = jax.random.split(key, 3)
    bound = 1.0 / math.sqrt(dim)
    params["final_w"] = jax.random.uniform(kw, (data_dim, dim), jnp.float32, -bound, bound)
    params["final_b"] = jax.random.uniform(kb, (data_dim,), jnp.float32, -bound, bound)
    return params


def prepare_kernel_params(params, embedding_dim, generator_dim, data_dim,
                          matmul_dtype=jnp.bfloat16):
    """One-time layout plumbing (outside the kernel):
      * reorder weight rows from PyTorch concat order [relu_{k-1},...,relu_0, x]
        to kernel append order [x, relu_0, ..., relu_{k-1}],
      * transpose to (in, out),
      * zero-pad every concat segment (rows) and every output (cols) to 128 lanes,
      * cast matmul weights to `matmul_dtype` (bf16 by default), keep BN vectors f32.
    """
    block_dims = tuple(int(v) for v in generator_dim)
    n = len(block_dims)
    e_pad = _round_up(embedding_dim, _LANES)
    block_pads = tuple(_round_up(o, _LANES) for o in block_dims)
    seg_true = (embedding_dim,) + block_dims          # kernel segment order
    seg_pad = (e_pad,) + block_pads
    out_pad = _round_up(data_dim, _LANES)

    def pt_row_offset(seg_idx, k):
        # Row offset of kernel segment seg_idx inside the transposed PyTorch weight
        # of the layer consuming k residual outputs (PyTorch order [relu_{k-1},...,relu_0,x]).
        if seg_idx == 0:                               # x
            return sum(block_dims[:k])
        return sum(block_dims[seg_idx:k])              # relu_{seg_idx-1}

    def build_weight(w_pt, k, o_true, o_out_pad):
        w_t = jnp.asarray(w_pt, jnp.float32).T          # (in_true, o_true), PyTorch row order
        pieces = []
        for s in range(k + 1):
            size = seg_true[s]
            start = pt_row_offset(s, k)
            piece = w_t[start:start + size, :]
            piece = jnp.pad(piece, ((0, seg_pad[s] - size), (0, o_out_pad - o_true)))
            pieces.append(piece)
        return jnp.concatenate(pieces, axis=0).astype(matmul_dtype)

    prepared = {
        "e_pad": e_pad,
        "block_pads": block_pads,
        "total_pad": e_pad + sum(block_pads),
        "data_dim": data_dim,
        "out_pad": out_pad,
        "compute_dtype": matmul_dtype,
        "residuals": [],
    }
    for k, blk in enumerate(params["residuals"]):
        o, o_p = block_dims[k], block_pads[k]
        prepared["residuals"].append({
            "w": build_weight(blk["w"], k, o, o_p),                        # (in_pad_k, o_pad_k)
            "gamma": jnp.pad(blk["gamma"], (0, o_p - o)).reshape(1, o_p),  # f32
            "beta": jnp.pad(blk["beta"], (0, o_p - o)).reshape(1, o_p),    # f32
            # fc bias intentionally dropped: cancels under training-mode BatchNorm.
        })
    prepared["final_w"] = build_weight(params["final_w"], n, data_dim, out_pad)
    prepared["final_b"] = jnp.pad(params["final_b"],
                                  (0, out_pad - data_dim)).reshape(1, out_pad).astype(jnp.float32)
    return prepared


# ----------------------------------------------------------------------------
# Forward (single fused pallas_call) and pure-JAX reference
# ----------------------------------------------------------------------------
def generator_forward(prepared, x):
    batch, embedding_dim = x.shape
    cd = prepared["compute_dtype"]
    e_pad = prepared["e_pad"]
    block_pads = prepared["block_pads"]
    total_pad = prepared["total_pad"]
    out_pad = prepared["out_pad"]
    data_dim = prepared["data_dim"]

    sublane = 16 if cd == jnp.bfloat16 else 8
    b_pad = _round_up(batch, sublane)
    x_p = jnp.pad(x.astype(jnp.float32),
                  ((0, b_pad - batch), (0, e_pad - embedding_dim)))

    # Output tile width along N (divides out_pad, which is a multiple of 128).
    tn = next(t for t in (512, 256, 128) if out_pad % t == 0)
    grid = (out_pad // tn,)

    kernel = _make_fused_kernel(batch, b_pad, e_pad, block_pads, cd)

    inputs = [x_p]
    in_specs = [pl.BlockSpec((b_pad, e_pad), lambda j: (0, 0))]
    for k, blk in enumerate(prepared["residuals"]):
        in_k = blk["w"].shape[0]
        o_p = block_pads[k]
        inputs += [blk["w"], blk["gamma"], blk["beta"]]
        in_specs += [pl.BlockSpec((in_k, o_p), lambda j: (0, 0)),
                     pl.BlockSpec((1, o_p), lambda j: (0, 0)),
                     pl.BlockSpec((1, o_p), lambda j: (0, 0))]
    inputs += [prepared["final_w"], prepared["final_b"]]
    in_specs += [pl.BlockSpec((total_pad, tn), lambda j: (0, j)),
                 pl.BlockSpec((1, tn), lambda j: (0, j))]
    out_spec = pl.BlockSpec((b_pad, tn), lambda j: (0, j))

    # Cost estimate + explicit VMEM limit (scheduling hint / scoped-VMEM insurance).
    w_item = jnp.dtype(cd).itemsize
    res_w_bytes = sum(int(blk["w"].size) * w_item for blk in prepared["residuals"])
    fin_w_bytes = int(prepared["final_w"].size) * w_item
    flops = 2 * b_pad * (sum(int(blk["w"].shape[0]) * int(blk["w"].shape[1])
                             for blk in prepared["residuals"]) + total_pad * out_pad)
    bytes_accessed = int(x_p.size * 4 + res_w_bytes + fin_w_bytes
                         + sum(2 * p for p in block_pads) * 4
                         + out_pad * 4 + b_pad * out_pad * 4)
    cost = pl.CostEstimate(flops=int(flops),
                           transcendentals=int(sum(block_pads)),
                           bytes_accessed=bytes_accessed)

    resident_bytes = (x_p.size * 4 + res_w_bytes
                      + 2 * (total_pad * tn * w_item + tn * 4 + b_pad * tn * 4)
                      + b_pad * total_pad * 4)
    vmem_limit = int(min(max(2 * resident_bytes + (4 << 20), 32 << 20), 48 << 20))

    out_padded = pl.pallas_call(
        kernel,
        out_shape=jax.ShapeDtypeStruct((b_pad, out_pad), jnp.float32),
        grid_spec=pltpu.PrefetchScalarGridSpec(
            num_scalar_prefetch=0,
            grid=grid,
            in_specs=in_specs,
            out_specs=out_spec,
            scratch_shapes=[pltpu.VMEM((b_pad, total_pad), jnp.float32)],
        ),
        compiler_params=pltpu.CompilerParams(
            dimension_semantics=("arbitrary",),   # buf scratch carried across j
            vmem_limit_bytes=vmem_limit,
        ),
        cost_estimate=cost,
    )(*inputs)
    return out_padded[:batch, :data_dim]


def generator_forward_ref(params, x):
    """Pure-JAX reference with PyTorch-layout params (faithful to the module)."""
    h = x
    for layer in params["residuals"]:
        pre = h @ layer["w"].T + layer["b"]
        mean = jnp.mean(pre, axis=0, keepdims=True)
        var = jnp.mean((pre - mean) ** 2, axis=0, keepdims=True)
        pre = (pre - mean) / jnp.sqrt(var + _BN_EPS)
        pre = pre * layer["gamma"] + layer["beta"]
        h = jnp.concatenate([jnp.maximum(pre, 0.0), h], axis=1)
    return h @ params["final_w"].T + params["final_b"]


if __name__ == "__main__":
    # Small shapes consistent with the module's forward.
    batch = 8
    embedding_dim = 32
    generator_dim = (32, 64)
    data_dim = 16

    key = jax.random.PRNGKey(0)
    key, kx = jax.random.split(key)
    x = jax.random.normal(kx, (batch, embedding_dim), jnp.float32)

    params = init_generator_params(key, embedding_dim, generator_dim, data_dim)
    ref = generator_forward_ref(params, x)

    # 1) Exact-precision path (f32 matmuls): strict check vs PyTorch semantics.
    prep_f32 = prepare_kernel_params(params, embedding_dim, generator_dim, data_dim,
                                     matmul_dtype=jnp.float32)
    out_f32 = jax.block_until_ready(generator_forward(prep_f32, x))
    assert out_f32.shape == (batch, data_dim), out_f32.shape
    assert jnp.allclose(out_f32, ref, atol=1e-4, rtol=1e-4), \
        float(jnp.max(jnp.abs(out_f32 - ref)))

    # 2) Fast path (bf16 MXU operands, f32 accumulation & BN math): loose check.
    prep_bf16 = prepare_kernel_params(params, embedding_dim, generator_dim, data_dim,
                                      matmul_dtype=jnp.bfloat16)
    out_bf16 = jax.block_until_ready(generator_forward(prep_bf16, x))
    err = float(jnp.max(jnp.abs(out_bf16 - ref)))
    assert out_bf16.shape == (batch, data_dim), out_bf16.shape
    assert bool(jnp.isfinite(out_bf16).all()) and err < 0.3, err

    print("KERNEL_OK")
</pallas_src>

<mosaic_0001>
module attributes {stable_mosaic.version = 11 : i64} {
  func.func @kernel(%arg0: i32, %arg1: memref<8x128xf32, #tpu.memory_space<vmem>>, %arg2: memref<128x128xf32, #tpu.memory_space<vmem>>, %arg3: memref<1x128xf32, #tpu.memory_space<vmem>>, %arg4: memref<1x128xf32, #tpu.memory_space<vmem>>, %arg5: memref<256x128xf32, #tpu.memory_space<vmem>>, %arg6: memref<1x128xf32, #tpu.memory_space<vmem>>, %arg7: memref<1x128xf32, #tpu.memory_space<vmem>>, %arg8: memref<384x128xf32, #tpu.memory_space<vmem>>, %arg9: memref<1x128xf32, #tpu.memory_space<vmem>>, %arg10: memref<8x128xf32, #tpu.memory_space<vmem>>, %arg11: memref<8x384xf32, #tpu.memory_space<vmem>>) attributes {dimension_semantics = [#tpu.dimension_semantics<arbitrary>], iteration_bounds = array<i64: 1>, scalar_prefetch = 0 : i64, scratch_operands = 1 : i64, tpu.core_type = #tpu.core_type<tc>, window_params = [{pipeline_mode = #tpu.pipeline_mode<synchronous>, transform_indices = @transform_0, window_bounds = array<i64: 8, 128>}, {pipeline_mode = #tpu.pipeline_mode<synchronous>, transform_indices = @transform_1, window_bounds = array<i64: 128, 128>}, {pipeline_mode = #tpu.pipeline_mode<synchronous>, transform_indices = @transform_2, window_bounds = array<i64: 1, 128>}, {pipeline_mode = #tpu.pipeline_mode<synchronous>, transform_indices = @transform_3, window_bounds = array<i64: 1, 128>}, {pipeline_mode = #tpu.pipeline_mode<synchronous>, transform_indices = @transform_4, window_bounds = array<i64: 256, 128>}, {pipeline_mode = #tpu.pipeline_mode<synchronous>, transform_indices = @transform_5, window_bounds = array<i64: 1, 128>}, {pipeline_mode = #tpu.pipeline_mode<synchronous>, transform_indices = @transform_6, window_bounds = array<i64: 1, 128>}, {transform_indices = @transform_7, window_bounds = array<i64: 384, 128>}, {transform_indices = @transform_8, window_bounds = array<i64: 1, 128>}, {transform_indices = @transform_9, window_bounds = array<i64: 8, 128>}]} {
    %c0_i32 = arith.constant 0 : i32
    %0 = arith.cmpi eq, %arg0, %c0_i32 : i32
    %1 = arith.extui %0 : i1 to i32
    %c0_i32_0 = arith.constant 0 : i32
    %2 = arith.cmpi ne, %1, %c0_i32_0 : i32
    scf.if %2 {
      %c0_8 = arith.constant 0 : index
      %c0_9 = arith.constant 0 : index
      %10 = vector.load %arg1[%c0_8, %c0_9] : memref<8x128xf32, #tpu.memory_space<vmem>>, vector<8x128xf32>
      %c0_10 = arith.constant 0 : index
      %c0_11 = arith.constant 0 : index
      %11 = vector.load %arg11[%c0_10, %c0_11] : memref<8x384xf32, #tpu.memory_space<vmem>>, vector<8x128xf32>
      tpu.vector_store %arg11[%c0_10, %c0_11], %10 {strides = array<i32>} : memref<8x384xf32, #tpu.memory_space<vmem>>, vector<8x128xf32>,
      %c0_12 = arith.constant 0 : index
      %c0_13 = arith.constant 0 : index
      %12 = vector.load %arg2[%c0_12, %c0_13] : memref<128x128xf32, #tpu.memory_space<vmem>>, vector<128x128xf32>
      %cst_14 = arith.constant dense<0.000000e+00> : vector<8x128xf32>
      %13 = tpu.matmul %10, %12, %cst_14 {dimension_numbers = #tpu.dot_dimension_numbers<[1], [0], [0], [1], [0, 0, 1, 1], [], []>} : vector<8x128xf32>, vector<128x128xf32>, vector<8x128xf32> -> vector<8x128xf32>
      %cst_15 = arith.constant dense<0.000000e+00> : vector<128xf32>
      %14 = vector.multi_reduction <add>, %13, %cst_15 [0] : vector<8x128xf32> to vector<128xf32>
      %15 = vector.shape_cast %14 : vector<128xf32> to vector<1x128xf32>
      %cst_16 = arith.constant 1.250000e-01 : f32
      %16 = vector.broadcast %cst_16 : f32 to vector<1x128xf32>
      %17 = arith.mulf %15, %16 : vector<1x128xf32>
      %18 = arith.mulf %13, %13 : vector<8x128xf32>
      %cst_17 = arith.constant dense<0.000000e+00> : vector<128xf32>
      %19 = vector.multi_reduction <add>, %18, %cst_17 [0] : vector<8x128xf32> to vector<128xf32>
      %20 = vector.shape_cast %19 : vector<128xf32> to vector<1x128xf32>
      %cst_18 = arith.constant 1.250000e-01 : f32
      %21 = vector.broadcast %cst_18 : f32 to vector<1x128xf32>
      %22 = arith.mulf %20, %21 : vector<1x128xf32>
      %23 = arith.mulf %17, %17 : vector<1x128xf32>
      %24 = arith.subf %22, %23 : vector<1x128xf32>
      %cst_19 = arith.constant 0.000000e+00 : f32
      %25 = vector.broadcast %cst_19 : f32 to vector<1x128xf32>
      %26 = arith.maximumf %24, %25 : vector<1x128xf32>
      %c0_20 = arith.constant 0 : index
      %c0_21 = arith.constant 0 : index
      %27 = vector.load %arg3[%c0_20, %c0_21] : memref<1x128xf32, #tpu.memory_space<vmem>>, vector<1x128xf32>
      %cst_22 = arith.constant 9.99999974E-6 : f32
      %28 = vector.broadcast %cst_22 : f32 to vector<1x128xf32>
      %29 = arith.addf %26, %28 : vector<1x128xf32>
      %30 = math.rsqrt %29 : vector<1x128xf32>
      %31 = arith.mulf %27, %30 : vector<1x128xf32>
      %c0_23 = arith.constant 0 : index
      %c0_24 = arith.constant 0 : index
      %32 = vector.load %arg4[%c0_23, %c0_24] : memref<1x128xf32, #tpu.memory_space<vmem>>, vector<1x128xf32>
      %33 = arith.mulf %17, %31 : vector<1x128xf32>
      %34 = arith.subf %32, %33 : vector<1x128xf32>
      %35 = vector.broadcast %31 : vector<1x128xf32> to vector<8x128xf32>
      %36 = arith.mulf %13, %35 : vector<8x128xf32>
      %37 = vector.broadcast %34 : vector<1x128xf32> to vector<8x128xf32>
      %38 = arith.addf %36, %37 : vector<8x128xf32>
      %cst_25 = arith.constant 0.000000e+00 : f32
      %39 = vector.broadcast %cst_25 : f32 to vector<8x128xf32>
      %40 = arith.maximumf %38, %39 : vector<8x128xf32>
      %c0_26 = arith.constant 0 : index
      %c128 = arith.constant 128 : index
      %41 = vector.load %arg11[%c0_26, %c128] : memref<8x384xf32, #tpu.memory_space<vmem>>, vector<8x128xf32>
      tpu.vector_store %arg11[%c0_26, %c128], %40 {strides = array<i32>} : memref<8x384xf32, #tpu.memory_space<vmem>>, vector<8x128xf32>,
      %c0_27 = arith.constant 0 : index
      %c0_28 = arith.constant 0 : index
      %42 = vector.load %arg11[%c0_27, %c0_28] : memref<8x384xf32, #tpu.memory_space<vmem>>, vector<8x256xf32>
      %c0_29 = arith.constant 0 : index
      %c0_30 = arith.constant 0 : index
      %43 = vector.load %arg5[%c0_29, %c0_30] : memref<256x128xf32, #tpu.memory_space<vmem>>, vector<256x128xf32>
      %cst_31 = arith.constant dense<0.000000e+00> : vector<8x128xf32>
      %44 = tpu.matmul %42, %43, %cst_31 {dimension_numbers = #tpu.dot_dimension_numbers<[1], [0], [0], [1], [0, 0, 1, 1], [], []>} : vector<8x256xf32>, vector<256x128xf32>, vector<8x128xf32> -> vector<8x128xf32>
      %cst_32 = arith.constant dense<0.000000e+00> : vector<128xf32>
      %45 = vector.multi_reduction <add>, %44, %cst_32 [0] : vector<8x128xf32> to vector<128xf32>
      %46 = vector.shape_cast %45 : vector<128xf32> to vector<1x128xf32>
      %cst_33 = arith.constant 1.250000e-01 : f32
      %47 = vector.broadcast %cst_33 : f32 to vector<1x128xf32>
      %48 = arith.mulf %46, %47 : vector<1x128xf32>
      %49 = arith.mulf %44, %44 : vector<8x128xf32>
      %cst_34 = arith.constant dense<0.000000e+00> : vector<128xf32>
      %50 = vector.multi_reduction <add>, %49, %cst_34 [0] : vector<8x128xf32> to vector<128xf32>
      %51 = vector.shape_cast %50 : vector<128xf32> to vector<1x128xf32>
      %cst_35 = arith.constant 1.250000e-01 : f32
      %52 = vector.broadcast %cst_35 : f32 to vector<1x128xf32>
      %53 = arith.mulf %51, %52 : vector<1x128xf32>
      %54 = arith.mulf %48, %48 : vector<1x128xf32>
      %55 = arith.subf %53, %54 : vector<1x128xf32>
      %cst_36 = arith.constant 0.000000e+00 : f32
      %56 = vector.broadcast %cst_36 : f32 to vector<1x128xf32>
      %57 = arith.maximumf %55, %56 : vector<1x128xf32>
      %c0_37 = arith.constant 0 : index
      %c0_38 = arith.constant 0 : index
      %58 = vector.load %arg6[%c0_37, %c0_38] : memref<1x128xf32, #tpu.memory_space<vmem>>, vector<1x128xf32>
      %cst_39 = arith.constant 9.99999974E-6 : f32
      %59 = vector.broadcast %cst_39 : f32 to vector<1x128xf32>
      %60 = arith.addf %57, %59 : vector<1x128xf32>
      %61 = math.rsqrt %60 : vector<1x128xf32>
      %62 = arith.mulf %58, %61 : vector<1x128xf32>
      %c0_40 = arith.constant 0 : index
      %c0_41 = arith.constant 0 : index
      %63 = vector.load %arg7[%c0_40, %c0_41] : memref<1x128xf32, #tpu.memory_space<vmem>>, vector<1x128xf32>
      %64 = arith.mulf %48, %62 : vector<1x128xf32>
      %65 = arith.subf %63, %64 : vector<1x128xf32>
      %66 = vector.broadcast %62 : vector<1x128xf32> to vector<8x128xf32>
      %67 = arith.mulf %44, %66 : vector<8x128xf32>
      %68 = vector.broadcast %65 : vector<1x128xf32> to vector<8x128xf32>
      %69 = arith.addf %67, %68 : vector<8x128xf32>
      %cst_42 = arith.constant 0.000000e+00 : f32
      %70 = vector.broadcast %cst_42 : f32 to vector<8x128xf32>
      %71 = arith.maximumf %69, %70 : vector<8x128xf32>
      %c0_43 = arith.constant 0 : index
      %c256 = arith.constant 256 : index
      %72 = vector.load %arg11[%c0_43, %c256] : memref<8x384xf32, #tpu.memory_space<vmem>>, vector<8x128xf32>
      tpu.vector_store %arg11[%c0_43, %c256], %71 {strides = array<i32>} : memref<8x384xf32, #tpu.memory_space<vmem>>, vector<8x128xf32>,
    } else {
    }
    %c0 = arith.constant 0 : index
    %c0_1 = arith.constant 0 : index
    %3 = vector.load %arg11[%c0, %c0_1] : memref<8x384xf32, #tpu.memory_space<vmem>>, vector<8x384xf32>
    %c0_2 = arith.constant 0 : index
    %c0_3 = arith.constant 0 : index
    %4 = vector.load %arg8[%c0_2, %c0_3] : memref<384x128xf32, #tpu.memory_space<vmem>>, vector<384x128xf32>
    %cst = arith.constant dense<0.000000e+00> : vector<8x128xf32>
    %5 = tpu.matmul %3, %4, %cst {dimension_numbers = #tpu.dot_dimension_numbers<[1], [0], [0], [1], [0, 0, 1, 1], [], []>} : vector<8x384xf32>, vector<384x128xf32>, vector<8x128xf32> -> vector<8x128xf32>
    %c0_4 = arith.constant 0 : index
    %c0_5 = arith.constant 0 : index
    %6 = vector.load %arg9[%c0_4, %c0_5] : memref<1x128xf32, #tpu.memory_space<vmem>>, vector<1x128xf32>
    %7 = vector.broadcast %6 : vector<1x128xf32> to vector<8x128xf32>
    %8 = arith.addf %5, %7 : vector<8x128xf32>
    %c0_6 = arith.constant 0 : index
    %c0_7 = arith.constant 0 : index
    %9 = vector.load %arg10[%c0_6, %c0_7] : memref<8x128xf32, #tpu.memory_space<vmem>>, vector<8x128xf32>
    tpu.vector_store %arg10[%c0_6, %c0_7], %8 {strides = array<i32>} : memref<8x128xf32, #tpu.memory_space<vmem>>, vector<8x128xf32>,
    return
  }
  func.func @transform_0(%arg0: i32) -> (i32, i32) {
    %c0_i32 = arith.constant 0 : i32
    %c0_i32_0 = arith.constant 0 : i32
    %c0_i32_1 = arith.constant 0 : i32
    return %c0_i32, %c0_i32_0 : i32, i32
  }
  func.func @transform_1(%arg0: i32) -> (i32, i32) {
    %c0_i32 = arith.constant 0 : i32
    %c0_i32_0 = arith.constant 0 : i32
    %c0_i32_1 = arith.constant 0 : i32
    return %c0_i32, %c0_i32_0 : i32, i32
  }
  func.func @transform_2(%arg0: i32) -> (i32, i32) {
    %c0_i32 = arith.constant 0 : i32
    %c0_i32_0 = arith.constant 0 : i32
    %c0_i32_1 = arith.constant 0 : i32
    return %c0_i32, %c0_i32_0 : i32, i32
  }
  func.func @transform_3(%arg0: i32) -> (i32, i32) {
    %c0_i32 = arith.constant 0 : i32
    %c0_i32_0 = arith.constant 0 : i32
    %c0_i32_1 = arith.constant 0 : i32
    return %c0_i32, %c0_i32_0 : i32, i32
  }
  func.func @transform_4(%arg0: i32) -> (i32, i32) {
    %c0_i32 = arith.constant 0 : i32
    %c0_i32_0 = arith.constant 0 : i32
    %c0_i32_1 = arith.constant 0 : i32
    return %c0_i32, %c0_i32_0 : i32, i32
  }
  func.func @transform_5(%arg0: i32) -> (i32, i32) {
    %c0_i32 = arith.constant 0 : i32
    %c0_i32_0 = arith.constant 0 : i32
    %c0_i32_1 = arith.constant 0 : i32
    return %c0_i32, %c0_i32_0 : i32, i32
  }
  func.func @transform_6(%arg0: i32) -> (i32, i32) {
    %c0_i32 = arith.constant 0 : i32
    %c0_i32_0 = arith.constant 0 : i32
    %c0_i32_1 = arith.constant 0 : i32
    return %c0_i32, %c0_i32_0 : i32, i32
  }
  func.func @transform_7(%arg0: i32) -> (i32, i32) {
    %c0_i32 = arith.constant 0 : i32
    %c0_i32_0 = arith.constant 0 : i32
    return %c0_i32, %arg0 : i32, i32
  }
  func.func @transform_8(%arg0: i32) -> (i32, i32) {
    %c0_i32 = arith.constant 0 : i32
    %c0_i32_0 = arith.constant 0 : i32
    return %c0_i32, %arg0 : i32, i32
  }
  func.func @transform_9(%arg0: i32) -> (i32, i32) {
    %c0_i32 = arith.constant 0 : i32
    %c0_i32_0 = arith.constant 0 : i32
    return %c0_i32, %arg0 : i32, i32
  }
}

</mosaic_0001>

<bundles_post_ra>
// kernel: tpu_custom_call.1
= control target key start
LH: loop header
LB: loop body
LE: loop exit
PB: predicated region body
PF: predicated region fallthrough
CT: control target
= control target key end

     0   :  { %14 = vsyncpa [#allocation4], 0  ;;  %s1174_s0 = inlined_call_operand.hbm [shape: f32[8,128], index: 0, kind: input, shape index: {}]   ;;  %s1175_s1 = inlined_call_operand.hbm [shape: f32[128,128], index: 1, kind: input, shape index: {}]   ;;  %s1176_s2 = inlined_call_operand.vmem [shape: f32[1,128], index: 2, kind: input, shape index: {}]   ;;  %s1177_s3 = inlined_call_operand.vmem [shape: f32[1,128], index: 3, kind: input, shape index: {}]   ;;  %s1178_s4 = inlined_call_operand.hbm [shape: f32[256,128], index: 4, kind: input, shape index: {}]   ;;  %s1179_s5 = inlined_call_operand.vmem [shape: f32[1,128], index: 5, kind: input, shape index: {}]   ;;  %s1180_s6 = inlined_call_operand.vmem [shape: f32[1,128], index: 6, kind: input, shape index: {}]   ;;  %s1181_s7 = inlined_call_operand.hbm [shape: f32[384,128], index: 7, kind: input, shape index: {}]   ;;  %s1182_s8 = inlined_call_operand.vmem [shape: f32[1,128], index: 8, kind: input, shape index: {}]   ;;  %s1183_s9 = inlined_call_operand.hbm [shape: f32[8,128], index: 9, kind: output, shape index: {}]  }
   0x1   :  { %15 = vsyncpa [#allocation7], 0 }
   0x2   :  { %16 = vsyncpa [#allocation10], 0 }
   0x3   :  { %17 = vsyncpa [#allocation5], 0  ;;  %s999_s30 = smov [#allocation6]   ;;  %s881_s13 = scalar_lea.hbm %s1175_s1, 2048 }
   0x4   :  { %s33_s10 = sshll.u32 %s999_s30, 4  ;;  %p882_p0 = scmp.ne.s32.totalorder %s1175_s1, %s881_s13  ;;  %s34_s10 = int_to_ptr.vmem [resolvable:$true] %s33_s10 }
   0x5   :  { %p885_p1 = scmp.lt.u32.totalorder %s881_s13, %s1175_s1 }
   0x7   :  { %p887_p2 = pnand %p885_p1, %p882_p0 }
   0x9   :  { %890 = shalt.err (!%p887_p2)
}
   0xa   :  { %s891_s18 = scalar_lea.vmem %s34_s10, 2048  ;;  %p896_p4 = scmp.lt.s32.totalorder %s34_s10, %s34_s10 }
   0xb   :  { %p892_p3 = scmp.ne.s32.totalorder %s34_s10, %s891_s18  ;;  %p897_p5 = scmp.lt.s32.totalorder %s891_s18, %s891_s18 }
   0xd   :  { %p898_p6 = por %p897_p5, %p896_p4 }
   0xf   :  { %p899_p7 = pnand %p898_p6, %p892_p3 }
  0x11   :  { %902 = shalt.err (!%p899_p7)
}
  0x12   :  { %s1000_s19 = smov 128   ;;  %s1001_s20 = smov 8  }
  0x13   :  { %39 = dma.hbm_to_vmem [thread:$0]  %s1175_s1, 2048, %s34_s10, [#allocation7], %s1000_s19, %s1000_s19, %s1001_s20  }
  0x14   :  { %s1002_s23 = smov [#allocation3]   ;;  %s1003_s25 = smov [#allocation8]  }
  0x15   :  { %s24_s24 = sshll.u32 %s1002_s23, 4  ;;  %s49_s26 = sshll.u32 %s1003_s25, 4  ;;  %s25_s24 = int_to_ptr.vmem [resolvable:$true] %s24_s24  ;;  %s50_s26 = int_to_ptr.vmem [resolvable:$true] %s49_s26 }
  0x16   :  { %s903_s29 = scalar_lea.hbm %s1174_s0, 128 }
  0x17   :  { %p904_p8 = scmp.ne.s32.totalorder %s1174_s0, %s903_s29  ;;  %p907_p9 = scmp.lt.u32.totalorder %s903_s29, %s1174_s0 }
  0x19   :  { %p909_p10 = pnand %p907_p9, %p904_p8 }
  0x1b   :  { %912 = shalt.err (!%p909_p10)
}
  0x1c   :  { %s913_s1 = scalar_lea.vmem %s25_s24, 128  ;;  %p918_p12 = scmp.lt.s32.totalorder %s25_s24, %s25_s24 }
  0x1d   :  { %p914_p11 = scmp.ne.s32.totalorder %s25_s24, %s913_s1  ;;  %p919_p13 = scmp.lt.s32.totalorder %s913_s1, %s913_s1 }
  0x1f   :  { %p920_p0 = por %p919_p13, %p918_p12 }
  0x21   :  { %p921_p1 = pnand %p920_p0, %p914_p11 }
  0x23   :  { %924 = shalt.err (!%p921_p1)
}
  0x24   :  { %27 = dma.hbm_to_vmem [thread:$0]  %s1174_s0, 128, %s25_s24, [#allocation4]  }
  0x25   :  { %s925_s17 = scalar_lea.hbm %s1178_s4, 4096 }
  0x26   :  { %p926_p2 = scmp.ne.s32.totalorder %s1178_s4, %s925_s17  ;;  %p929_p3 = scmp.lt.u32.totalorder %s925_s17, %s1178_s4 }
  0x28   :  { %p931_p4 = pnand %p929_p3, %p926_p2 }
  0x2a   :  { %934 = shalt.err (!%p931_p4)
}
  0x2b   :  { %s935_s25 = scalar_lea.vmem %s50_s26, 4096  ;;  %p940_p6 = scmp.lt.s32.totalorder %s50_s26, %s50_s26 }
  0x2c   :  { %p936_p5 = scmp.ne.s32.totalorder %s50_s26, %s935_s25  ;;  %p941_p7 = scmp.lt.s32.totalorder %s935_s25, %s935_s25 }
  0x2e   :  { %p942_p8 = por %p941_p7, %p940_p6 }
  0x30   :  { %p943_p9 = pnand %p942_p8, %p936_p5 }
  0x32   :  { %946 = shalt.err (!%p943_p9)
}
  0x33   :  { %55 = dma.hbm_to_vmem [thread:$0]  %s1178_s4, 4096, %s50_s26, [#allocation7], %s1000_s19, %s1000_s19, %s1001_s20  }
  0x34   :  { %s1004_s27 = smov [#allocation9]   ;;  %s947_s11 = scalar_lea.hbm %s1181_s7, 6144 }
  0x35   :  { %s65_s28 = sshll.u32 %s1004_s27, 4  ;;  %p948_p10 = scmp.ne.s32.totalorder %s1181_s7, %s947_s11  ;;  %s66_s28 = int_to_ptr.vmem [resolvable:$true] %s65_s28 }
  0x36   :  { %p951_p11 = scmp.lt.u32.totalorder %s947_s11, %s1181_s7 }
  0x38   :  { %p953_p12 = pnand %p951_p11, %p948_p10 }
  0x3a   :  { %956 = shalt.err (!%p953_p12)
}
  0x3b   :  { %s957_s14 = scalar_lea.vmem %s66_s28, 6144  ;;  %p962_p0 = scmp.lt.s32.totalorder %s66_s28, %s66_s28 }
  0x3c   :  { %p958_p13 = scmp.ne.s32.totalorder %s66_s28, %s957_s14  ;;  %p963_p1 = scmp.lt.s32.totalorder %s957_s14, %s957_s14 }
  0x3e   :  { %p964_p2 = por %p963_p1, %p962_p0 }
  0x40   :  { %p965_p3 = pnand %p964_p2, %p958_p13 }
  0x42   :  { %968 = shalt.err (!%p965_p3)
}
  0x43   :  { %71 = dma.hbm_to_vmem [thread:$0]  %s1181_s7, 6144, %s66_s28, [#allocation10], %s1000_s19, %s1000_s19, %s1001_s20  }
  0x44   :  { %991 = dma.done.wait [#allocation4], 128  }
  0x45   :  { %992 = vsyncadd [#allocation4], 4294967168 }
  0x46   :  { %993 = dma.done.wait [#allocation7], 6144  }
  0x47   :  { %994 = vsyncadd [#allocation7], 4294961152 }
  0x48   :  { %995 = dma.done.wait [#allocation10], 6144  }
  0x49   :  { %996 = vsyncadd [#allocation10], 4294961152  ;;  %v1005_v0 = vmov 0.0|0.0   ;;  %vm1006_vm0 = vmmov 0   ;;  %v1007_v1 = vmov 0.0   ;;  %v92_v2 = vld [vmem:[#allocation6] sm:$0xff] }
  0x4a   :  { %755 = vmatprep.subr.bf16.mxu0 %v1005_v0  ;;  %717 = vmatprep.mubr.msk.f32.mxu0 %vm1006_vm0, %v1007_v1  ;;  %v93_v3 = vld [vmem:[#allocation6 + $0x8] sm:$0xff]  ;;  %v94_v4 = vld [vmem:[#allocation6 + $0x10] sm:$0xff]  ;;  %v95_v6 = vld [vmem:[#allocation6 + $0x18] sm:$0xff]  ;;  %s1008_s21 = smov [#allocation11]  }
  0x4b   :  { %v756_v5 = vpack.c.bf16 %v93_v3, %v92_v2  ;;  %v759_v7 = vpack.c.bf16 %v95_v6, %v94_v4  ;;  %v96_v8 = vld [vmem:[#allocation6 + $0x20] sm:$0xff]  ;;  %v97_v9 = vld [vmem:[#allocation6 + $0x28] sm:$0xff]  ;;  %v98_v11 = vld [vmem:[#allocation6 + $0x30] sm:$0xff] }
  0x4c   :  { %v762_v10 = vpack.c.bf16 %v97_v9, %v96_v8  ;;  %v99_v12 = vld [vmem:[#allocation6 + $0x38] sm:$0xff]  ;;  %v100_v14 = vld [vmem:[#allocation6 + $0x40] sm:$0xff]  ;;  %v101_v15 = vld [vmem:[#allocation6 + $0x48] sm:$0xff] }
  0x4d   :  { %757 = vmatpush3.bf16.msra.mxu0 %v756_v5  ;;  %v765_v13 = vpack.c.bf16 %v99_v12, %v98_v11  ;;  %v768_v16 = vpack.c.bf16 %v101_v15, %v100_v14  ;;  %v102_v17 = vld [vmem:[#allocation6 + $0x50] sm:$0xff]  ;;  %v103_v18 = vld [vmem:[#allocation6 + $0x58] sm:$0xff]  ;;  %v104_v20 = vld [vmem:[#allocation6 + $0x60] sm:$0xff] }
  0x4e   :  { %758 = vmatprep.subr.bf16.mxu0 %v1005_v0  ;;  %v771_v19 = vpack.c.bf16 %v103_v18, %v102_v17  ;;  %v105_v21 = vld [vmem:[#allocation6 + $0x68] sm:$0xff]  ;;  %v106_v23 = vld [vmem:[#allocation6 + $0x70] sm:$0xff]  ;;  %v107_v24 = vld [vmem:[#allocation6 + $0x78] sm:$0xff] }
  0x4f   :  { %v774_v22 = vpack.c.bf16 %v105_v21, %v104_v20  ;;  %v777_v25 = vpack.c.bf16 %v107_v24, %v106_v23  ;;  %v1126_v26 = vld [vmem:[#allocation3] sm:$0xff]  ;;  %v237_v27 = vld [vmem:[#allocation8 + $0x80] sm:$0xff]  ;;  %v238_v28 = vld [vmem:[#allocation8 + $0x88] sm:$0xff] }
  0x50   :  { %v779_v29 = vpack.c.bf16 %v238_v28, %v237_v27  ;;  %v221_v30 = vld [vmem:[#allocation8] sm:$0xff]  ;;  %v222_v31 = vld [vmem:[#allocation8 + $0x8] sm:$0xff]  ;;  %v239_v33 = vld [vmem:[#allocation8 + $0x90] sm:$0xff] }
  0x51   :  { %760 = vmatpush3.bf16.msra.mxu0 %v759_v7  ;;  %v781_v32 = vpack.c.bf16 %v222_v31, %v221_v30  ;;  %v240_v34 = vld [vmem:[#allocation8 + $0x98] sm:$0xff]  ;;  %v223_v35 = vld [vmem:[#allocation8 + $0x10] sm:$0xff]  ;;  %v241_v38 = vld [vmem:[#allocation8 + $0xa0] sm:$0xff] }
  0x52   :  { %761 = vmatprep.subr.bf16.mxu0 %v1005_v0  ;;  %780 = vmatprep.subr.bf16.mxu1 %v779_v29  ;;  %v783_v36 = vpack.c.bf16 %v240_v34, %v239_v33  ;;  %v224_v37 = vld [vmem:[#allocation8 + $0x18] sm:$0xff]  ;;  %v242_v39 = vld [vmem:[#allocation8 + $0xa8] sm:$0xff]  ;;  %v225_v42 = vld [vmem:[#allocation8 + $0x20] sm:$0xff] }
  0x53   :  { %782 = vmatpush3.bf16.msra.mxu1 %v781_v32  ;;  %v785_v40 = vpack.c.bf16 %v224_v37, %v223_v35  ;;  %v787_v41 = vpack.c.bf16 %v242_v39, %v241_v38  ;;  %v226_v43 = vld [vmem:[#allocation8 + $0x28] sm:$0xff]  ;;  %v243_v44 = vld [vmem:[#allocation8 + $0xb0] sm:$0xff]  ;;  %v244_v45 = vld [vmem:[#allocation8 + $0xb8] sm:$0xff]  ;;  %v204_v35 = vlaneseq }
  0x54   :  { %784 = vmatprep.subr.bf16.mxu1 %v783_v36  ;;  %v789_v46 = vpack.c.bf16 %v226_v43, %v225_v42  ;;  %v791_v47 = vpack.c.bf16 %v244_v45, %v243_v44  ;;  %v227_v48 = vld [vmem:[#allocation8 + $0x30] sm:$0xff]  ;;  %v228_v49 = vld [vmem:[#allocation8 + $0x38] sm:$0xff]  ;;  %v245_v50 = vld [vmem:[#allocation8 + $0xc0] sm:$0xff] }
  0x55   :  { %763 = vmatpush3.bf16.msra.mxu0 %v762_v10  ;;  %v246_v51 = vld [vmem:[#allocation8 + $0xc8] sm:$0xff]  ;;  %v793_v52 = vpack.c.bf16 %v228_v49, %v227_v48  ;;  %v229_v54 = vld [vmem:[#allocation8 + $0x40] sm:$0xff]  ;;  %v247_v56 = vld [vmem:[#allocation8 + $0xd0] sm:$0xff]  ;;  %v205_v36 = vshrl.u32 %v204_v35, 7 }
  0x56   :  { %764 = vmatprep.subr.bf16.mxu0 %v1005_v0  ;;  %v795_v53 = vpack.c.bf16 %v246_v51, %v245_v50  ;;  %v230_v55 = vld [vmem:[#allocation8 + $0x48] sm:$0xff]  ;;  %v248_v57 = vld [vmem:[#allocation8 + $0xd8] sm:$0xff]  ;;  %v231_v60 = vld [vmem:[#allocation8 + $0x50] sm:$0xff] }
  0x57   :  { %786 = vmatpush3.bf16.msra.mxu1 %v785_v40  ;;  %v797_v58 = vpack.c.bf16 %v230_v55, %v229_v54  ;;  %v799_v59 = vpack.c.bf16 %v248_v57, %v247_v56  ;;  %v232_v61 = vld [vmem:[#allocation8 + $0x58] sm:$0xff]  ;;  %v249_v62 = vld [vmem:[#allocation8 + $0xe0] sm:$0xff]  ;;  %v250_v63 = vld [vmem:[#allocation8 + $0xe8] sm:$0xff]  ;;  %v1133_v38 = vsub.s32 0, %v205_v36 }
  0x58   :  { %788 = vmatprep.subr.bf16.mxu1 %v787_v41  ;;  %v801_v2 = vpack.c.bf16 %v232_v61, %v231_v60  ;;  %v803_v3 = vpack.c.bf16 %v250_v63, %v249_v62  ;;  %v233_v4 = vld [vmem:[#allocation8 + $0x60] sm:$0xff]  ;;  %v234_v5 = vld [vmem:[#allocation8 + $0x68] sm:$0xff]  ;;  %v251_v6 = vld [vmem:[#allocation8 + $0xf0] sm:$0xff] }
  0x59   :  { %766 = vmatpush3.bf16.msra.mxu0 %v765_v13  ;;  %v252_v7 = vld [vmem:[#allocation8 + $0xf8] sm:$0xff]  ;;  %v805_v8 = vpack.c.bf16 %v234_v5, %v233_v4  ;;  %v235_v10 = vld [vmem:[#allocation8 + $0x70] sm:$0xff]  ;;  %v383_v49 = vld [vmem:[#allocation9 + $0x80] sm:$0xff] }
  0x5a   :  { %767 = vmatprep.subr.bf16.mxu0 %v1005_v0  ;;  %v807_v9 = vpack.c.bf16 %v252_v7, %v251_v6  ;;  %v236_v11 = vld [vmem:[#allocation8 + $0x78] sm:$0xff]  ;;  %v384_v50 = vld [vmem:[#allocation9 + $0x88] sm:$0xff]  ;;  %v385_v55 = vld [vmem:[#allocation9 + $0x90] sm:$0xff] }
  0x5b   :  { %790 = vmatpush3.bf16.msra.mxu1 %v789_v46  ;;  %v809_v12 = vpack.c.bf16 %v236_v11, %v235_v10  ;;  %v196_v37 = vld [vmem:[%s1176_s2] sm:$0x1]  ;;  %v811_v51 = vpack.c.bf16 %v384_v50, %v383_v49  ;;  %v399_v61 = vld [vmem:[#allocation9 + $0x100] sm:$0xff]  ;;  %v400_v62 = vld [vmem:[#allocation9 + $0x108] sm:$0xff] }
  0x5c   :  { %792 = vmatprep.subr.bf16.mxu1 %v791_v47  ;;  %v200_v41 = vld [vmem:[%s1177_s3] sm:$0x1]  ;;  %v844_v63 = vpack.c.bf16 %v400_v62, %v399_v61  ;;  %v371_v4 = vld [vmem:[#allocation9 + $0x20] sm:$0xff]  ;;  %v372_v5 = vld [vmem:[#allocation9 + $0x28] sm:$0xff] }
  0x5d   :  { %769 = vmatpush3.bf16.msra.mxu0 %v768_v16  ;;  %v386_v56 = vld [vmem:[#allocation9 + $0x98] sm:$0xff]  ;;  %v821_v6 = vpack.c.bf16 %v372_v5, %v371_v4  ;;  %v401_v7 = vld [vmem:[#allocation9 + $0x110] sm:$0xff]  ;;  %v407_v35 = vld [vmem:[#allocation9 + $0x140] sm:$0xff] }
  0x5e   :  { %770 = vmatprep.subr.bf16.mxu0 %v1005_v0  ;;  %v815_v57 = vpack.c.bf16 %v386_v56, %v385_v55  ;;  %v389_v10 = vld [vmem:[#allocation9 + $0xb0] sm:$0xff]  ;;  %v390_v11 = vld [vmem:[#allocation9 + $0xb8] sm:$0xff]  ;;  %v408_v36 = vld [vmem:[#allocation9 + $0x148] sm:$0xff] }
  0x5f   :  { %794 = vmatpush3.bf16.msra.mxu1 %v793_v52  ;;  %v367_v52 = vld [vmem:[#allocation9] sm:$0xff]  ;;  %v398_v49 = vld [vmem:[#allocation9 + $0xf8] sm:$0xff]  ;;  %v412_v55 = vld [vmem:[#allocation9 + $0x168] sm:$0xff] }
  0x60   :  { %796 = vmatprep.subr.bf16.mxu1 %v795_v53  ;;  %v368_v53 = vld [vmem:[#allocation9 + $0x8] sm:$0xff] }
  0x61   :  { %772 = vmatpush3.bf16.msra.mxu0 %v771_v19  ;;  %v813_v54 = vpack.c.bf16 %v368_v53, %v367_v52  ;;  %v382_v52 = vld [vmem:[#allocation9 + $0x78] sm:$0xff] }
  0x62   :  { %773 = vmatprep.subr.bf16.mxu0 %v1005_v0 }
  0x63   :  { %798 = vmatpush3.bf16.msra.mxu1 %v797_v58  ;;  %v369_v58 = vld [vmem:[#allocation9 + $0x10] sm:$0xff] }
  0x64   :  { %800 = vmatprep.subr.bf16.mxu1 %v799_v59  ;;  %v370_v59 = vld [vmem:[#allocation9 + $0x18] sm:$0xff] }
  0x65   :  { %775 = vmatpush3.bf16.msra.mxu0 %v774_v22  ;;  %v817_v60 = vpack.c.bf16 %v370_v59, %v369_v58  ;;  %v414_v58 = vld [vmem:[#allocation9 + $0x178] sm:$0xff] }
  0x66   :  { %776 = vmatprep.subr.bf16.mxu0 %v1005_v0 }
  0x67   :  { %802 = vmatpush3.bf16.msra.mxu1 %v801_v2  ;;  %v388_v2 = vld [vmem:[#allocation9 + $0xa8] sm:$0xff] }
  0x68   :  { %804 = vmatprep.subr.bf16.mxu1 %v803_v3 }
  0x69   :  { %778 = vmatpush3.bf16.msra.mxu0 %v777_v25 }
  0x6a   :  { %812 = vmatprep.subr.bf16.mxu0 %v811_v51  ;;  %v381_v51 = vld [vmem:[#allocation9 + $0x70] sm:$0xff] }
  0x6b   :  { %806 = vmatpush3.bf16.msra.mxu1 %v805_v8  ;;  %v402_v8 = vld [vmem:[#allocation9 + $0x118] sm:$0xff]  ;;  %v841_v53 = vpack.c.bf16 %v382_v52, %v381_v51 }
  0x6c   :  { %718 = vmatmul.mubr.f32.vlgmr.msra.gmra.mrb[0].mxu0 %v1126_v26  ;;  %808 = vmatprep.subr.bf16.mxu1 %v807_v9  ;;  %v847_v9 = vpack.c.bf16 %v402_v8, %v401_v7 }
  0x6d   :  { %814 = vmatpush3.bf16.msra.mxu0 %v813_v54  ;;  %v411_v54 = vld [vmem:[#allocation9 + $0x160] sm:$0xff] }
  0x6e   :  { %816 = vmatprep.subr.bf16.mxu0 %v815_v57  ;;  %v862_v56 = vpack.c.bf16 %v412_v55, %v411_v54  ;;  %v413_v57 = vld [vmem:[#allocation9 + $0x170] sm:$0xff] }
  0x6f   :  { %810 = vmatpush3.bf16.msra.mxu1 %v809_v12  ;;  %v823_v12 = vpack.c.bf16 %v390_v11, %v389_v10  ;;  %v865_v59 = vpack.c.bf16 %v414_v58, %v413_v57 }
  0x70   :  { %843 = vmatprep.subr.bf16.mxu1 %v1005_v0 }
  0x71   :  { %818 = vmatpush3.bf16.msra.mxu0 %v817_v60 }
 0x13f   :  { %v174_v13 = vpop.f32.mrb[0].mxu0 }
 0x140   :  { %v178_v14 = vrot.slane %v174_v13, 4  ;;  %v185_v15 = vmul.f32 %v174_v13, %v174_v13  ;;  %v719_v16 = vpop.f32.mrb[1].mxu0 }
 0x141   :  { %v403_v16 = vld [vmem:[#allocation9 + $0x120] sm:$0xff] }
 0x142   :  { %v179_v17 = vadd.f32 %v178_v14, %v174_v13  ;;  %v186_v18 = vrot.slane %v185_v15, 4  ;;  %v374_v14 = vld [vmem:[#allocation9 + $0x38] sm:$0xff] }
 0x144   :  { %v180_v19 = vrot.slane %v179_v17, 2  ;;  %v187_v20 = vadd.f32 %v186_v18, %v185_v15 }
 0x146   :  { %v181_v21 = vadd.f32 %v180_v19, %v179_v17  ;;  %v188_v22 = vrot.slane %v187_v20, 2  ;;  %v404_v17 = vld [vmem:[#allocation9 + $0x128] sm:$0xff]  ;;  %v391_v19 = vld [vmem:[#allocation9 + $0xc0] sm:$0xff] }
 0x147   :  { %v850_v18 = vpack.c.bf16 %v404_v17, %v403_v16  ;;  %v341_v17 = vld [vmem:[%s1179_s5] sm:$0x1] }
 0x148   :  { %v182_v23 = vrot.slane %v181_v21, 1  ;;  %v189_v24 = vadd.f32 %v188_v22, %v187_v20  ;;  %v392_v20 = vld [vmem:[#allocation9 + $0xc8] sm:$0xff]  ;;  %v375_v22 = vld [vmem:[#allocation9 + $0x40] sm:$0xff] }
 0x14a   :  { %v183_v25 = vadd.f32 %v182_v23, %v181_v21  ;;  %v190_v27 = vrot.slane %v189_v24, 1  ;;  %v827_v21 = vpack.c.bf16 %v392_v20, %v391_v19  ;;  %v376_v23 = vld [vmem:[#allocation9 + $0x48] sm:$0xff]  ;;  %v345_v20 = vld [vmem:[%s1180_s6] sm:$0x1]  ;;  %s569_s6 = sshll.u32 %s1008_s21, 4  ;;  %s570_s6 = int_to_ptr.vmem [resolvable:$true] %s569_s6 }
 0x14b   :  { %s969_s22 = scalar_lea.vmem %s570_s6, 128  ;;  %p974_p5 = scmp.lt.s32.totalorder %s570_s6, %s570_s6 }
 0x14c   :  { %v191_v28 = vadd.f32 %v190_v27, %v189_v24  ;;  %v184_v29 = vmul.f32 0.125, %v183_v25  ;;  %v829_v24 = vpack.c.bf16 %v376_v23, %v375_v22  ;;  %v405_v25 = vld [vmem:[#allocation9 + $0x130] sm:$0xff]  ;;  %v406_v27 = vld [vmem:[#allocation9 + $0x138] sm:$0xff]  ;;  %p970_p4 = scmp.ne.s32.totalorder %s570_s6, %s969_s22  ;;  %p975_p6 = scmp.lt.s32.totalorder %s969_s22, %s969_s22 }
 0x14e   :  { %v192_v30 = vmul.f32 0.125, %v191_v28  ;;  %v193_v31 = vmul.f32 %v184_v29, %v184_v29  ;;  %v853_v28 = vpack.c.bf16 %v406_v27, %v405_v25  ;;  %p976_p7 = por %p975_p6, %p974_p5 }
 0x150   :  { %v194_v32 = vsub.f32 %v192_v30, %v193_v31  ;;  %v394_v30 = vld [vmem:[#allocation9 + $0xd8] sm:$0xff]  ;;  %p977_p8 = pnand %p976_p7, %p970_p4 }
 0x152   :  { %v195_v33 = vmax.f32 %v194_v32, 0.0  ;;  %v377_v32 = vld [vmem:[#allocation9 + $0x50] sm:$0xff] }
 0x154   :  { %v197_v34 = vadd.f32 1e-05, %v195_v33  ;;  %v378_v33 = vld [vmem:[#allocation9 + $0x58] sm:$0xff] }
 0x156   :  { %877 = vrsqrt.f32 %v197_v34  ;;  %v833_v34 = vpack.c.bf16 %v378_v33, %v377_v32  ;;  %v580_v32 = vld [vmem:[%s1182_s8] ss:$0 sm:$0xff] }
 0x160   :  { %v878_v39 = vpop.eup %877 }
 0x161   :  { %v199_v40 = vmul.f32 %v878_v39, %v196_v37  ;;  %v856_v37 = vpack.c.bf16 %v408_v36, %v407_v35  ;;  %v395_v39 = vld [vmem:[#allocation9 + $0xe0] sm:$0xff] }
 0x163   :  { %v201_v42 = vmul.f32 %v199_v40, %v184_v29  ;;  %v207_v43 = vrot.slane %v199_v40, %v1133_v38  ;;  %v393_v29 = vld [vmem:[#allocation9 + $0xd0] sm:$0xff]  ;;  %v396_v40 = vld [vmem:[#allocation9 + $0xe8] sm:$0xff] }
 0x164   :  { %v831_v31 = vpack.c.bf16 %v394_v30, %v393_v29 }
 0x165   :  { %v202_v44 = vsub.f32 %v200_v41, %v201_v42  ;;  %v209_v45 = vmul.f32 %v207_v43, %v174_v13  ;;  %v373_v13 = vld [vmem:[#allocation9 + $0x30] sm:$0xff]  ;;  %v835_v41 = vpack.c.bf16 %v396_v40, %v395_v39  ;;  %v379_v42 = vld [vmem:[#allocation9 + $0x60] sm:$0xff]  ;;  %v380_v43 = vld [vmem:[#allocation9 + $0x68] sm:$0xff] }
 0x166   :  { %v825_v15 = vpack.c.bf16 %v374_v14, %v373_v13 }
 0x167   :  { %v214_v46 = vrot.slane %v202_v44, %v1133_v38  ;;  %v837_v44 = vpack.c.bf16 %v380_v43, %v379_v42 }
 0x169   :  { %v216_v47 = vadd.f32 %v214_v46, %v209_v45  ;;  %v409_v45 = vld [vmem:[#allocation9 + $0x150] sm:$0xff]  ;;  %v410_v46 = vld [vmem:[#allocation9 + $0x158] sm:$0xff] }
 0x16b   :  { %v217_v48 = vmax.f32 %v216_v47, 0.0  ;;  %v859_v47 = vpack.c.bf16 %v410_v46, %v409_v45 }
 0x16d   :  { %317 = vmatprep.mubr.f32.mxu1 %v217_v48  ;;  %486 = vmatprep.mubr.f32.mxu0 %v217_v48  ;;  %v397_v48 = vld [vmem:[#allocation9 + $0xf0] sm:$0xff] }
 0x16e   :  { %318 = vmatmul.mubr.f32.vlgmr.msra.gmra.mrb[0].mxu1 %v1126_v26  ;;  %v839_v50 = vpack.c.bf16 %v398_v49, %v397_v48 }
 0x16f   :  { %752 = vmatprep.mubr.msk.f32.mxu1 %vm1006_vm0, %v1007_v1  ;;  %v387_v1 = vld [vmem:[#allocation9 + $0xa0] sm:$0xff]  ;;  %845 = vmatpush3.bf16.msra.mxu1 %v844_v63 }
 0x170   :  { %v819_v3 = vpack.c.bf16 %v388_v2, %v387_v1  ;;  %846 = vmatprep.subr.bf16.mxu1 %v1005_v0 }
 0x172   :  { %820 = vmatprep.subr.bf16.mxu0 %v819_v3 }
 0x173   :  { %822 = vmatpush3.bf16.msra.mxu0 %v821_v6  ;;  %848 = vmatpush3.bf16.msra.mxu1 %v847_v9 }
 0x174   :  { %824 = vmatprep.subr.bf16.mxu0 %v823_v12  ;;  %849 = vmatprep.subr.bf16.mxu1 %v1005_v0 }
 0x177   :  { %826 = vmatpush3.bf16.msra.mxu0 %v825_v15  ;;  %851 = vmatpush3.bf16.msra.mxu1 %v850_v18 }
 0x178   :  { %828 = vmatprep.subr.bf16.mxu0 %v827_v21  ;;  %852 = vmatprep.subr.bf16.mxu1 %v1005_v0 }
 0x17b   :  { %830 = vmatpush3.bf16.msra.mxu0 %v829_v24  ;;  %854 = vmatpush3.bf16.msra.mxu1 %v853_v28 }
 0x17c   :  { %832 = vmatprep.subr.bf16.mxu0 %v831_v31  ;;  %855 = vmatprep.subr.bf16.mxu1 %v1005_v0 }
 0x17f   :  { %834 = vmatpush3.bf16.msra.mxu0 %v833_v34  ;;  %857 = vmatpush3.bf16.msra.mxu1 %v856_v37 }
 0x180   :  { %836 = vmatprep.subr.bf16.mxu0 %v835_v41  ;;  %858 = vmatprep.subr.bf16.mxu1 %v1005_v0 }
 0x183   :  { %838 = vmatpush3.bf16.msra.mxu0 %v837_v44  ;;  %860 = vmatpush3.bf16.msra.mxu1 %v859_v47 }
 0x184   :  { %840 = vmatprep.subr.bf16.mxu0 %v839_v50  ;;  %861 = vmatprep.subr.bf16.mxu1 %v1005_v0 }
 0x187   :  { %842 = vmatpush3.bf16.msra.mxu0 %v841_v53  ;;  %863 = vmatpush3.bf16.msra.mxu1 %v862_v56 }
 0x188   :  { %864 = vmatprep.subr.bf16.mxu1 %v1005_v0 }
 0x18a   :  { %487 = vmatmul.mubr.f32.vlgmr.msra.gmra.mrb[2].mxu0 %v1126_v26 }
 0x18b   :  { %866 = vmatpush3.bf16.msra.mxu1 %v865_v59 }
 0x241   :  { %v630_v60 = vpop.f32.mrb[0].mxu1 }
 0x242   :  { %v631_v61 = vpop.f32.mrb[1].mxu1 }
 0x243   :  { %v632_v62 = vadd.f32 %v631_v61, %v630_v60 }
 0x245   :  { %v323_v63 = vrot.slane %v632_v62, 4  ;;  %v330_v1 = vmul.f32 %v632_v62, %v632_v62 }
 0x247   :  { %v324_v2 = vadd.f32 %v632_v62, %v323_v63  ;;  %v331_v3 = vrot.slane %v330_v1, 4 }
 0x249   :  { %v325_v4 = vrot.slane %v324_v2, 2  ;;  %v332_v5 = vadd.f32 %v331_v3, %v330_v1 }
 0x24b   :  { %v326_v6 = vadd.f32 %v325_v4, %v324_v2  ;;  %v333_v7 = vrot.slane %v332_v5, 2 }
 0x24d   :  { %v327_v8 = vrot.slane %v326_v6, 1  ;;  %v334_v9 = vadd.f32 %v333_v7, %v332_v5 }
 0x24f   :  { %v328_v10 = vadd.f32 %v327_v8, %v326_v6  ;;  %v335_v11 = vrot.slane %v334_v9, 1 }
 0x251   :  { %v329_v12 = vmul.f32 0.125, %v328_v10  ;;  %v336_v26 = vadd.f32 %v335_v11, %v334_v9 }
 0x253   :  { %v337_v13 = vmul.f32 0.125, %v336_v26  ;;  %v338_v0 = vmul.f32 %v329_v12, %v329_v12 }
 0x255   :  { %v339_v14 = vsub.f32 %v337_v13, %v338_v0 }
 0x257   :  { %v340_v15 = vmax.f32 %v339_v14, 0.0 }
 0x259   :  { %v342_v16 = vadd.f32 1e-05, %v340_v15 }
 0x25b   :  { %879 = vrsqrt.f32 %v342_v16 }
 0x25d   :  { %v665_v29 = vpop.f32.mrb[2].mxu0 }
 0x25e   :  { %v666_v30 = vpop.f32.mrb[3].mxu0 }
 0x25f   :  { %v667_v31 = vadd.f32 %v666_v30, %v665_v29 }
 0x261   :  { %v489_v33 = vadd.f32 %v667_v31, %v580_v32 }
 0x265   :  { %v880_v18 = vpop.eup %879 }
 0x266   :  { %v344_v19 = vmul.f32 %v880_v18, %v341_v17 }
 0x268   :  { %v352_v21 = vrot.slane %v344_v19, %v1133_v38  ;;  %v346_v22 = vmul.f32 %v344_v19, %v329_v12 }
 0x26a   :  { %v347_v23 = vsub.f32 %v345_v20, %v346_v22  ;;  %v354_v24 = vmul.f32 %v632_v62, %v352_v21 }
 0x26c   :  { %v359_v25 = vrot.slane %v347_v23, %v1133_v38 }
 0x26e   :  { %v361_v27 = vadd.f32 %v359_v25, %v354_v24 }
 0x270   :  { %v362_v28 = vmax.f32 %v361_v27, 0.0 }
 0x272   :  { %753 = vmatmul.mubr.f32.vlgmr.msra.gmra.mrb[2].mxu1 %v362_v28 }
 0x345   :  { %v558_v34 = vpop.f32.mrb[2].mxu1 }
 0x346   :  { %v559_v35 = vadd.f32 %v558_v34, %v489_v33  ;;  %v754_v36 = vpop.f32.mrb[3].mxu1 }
 0x348   :  { %562 = vst [vmem:[#allocation11] sm:$0xff] %v559_v35 }
 0x349   :  { %980 = shalt.err (!%p977_p8)
}
 0x34a   :  { %s981_s0 = scalar_lea.hbm %s1183_s9, 128 }
 0x34b   :  { %p982_p9 = scmp.ne.s32.totalorder %s1183_s9, %s981_s0  ;;  %p985_p10 = scmp.lt.u32.totalorder %s981_s0, %s1183_s9 }
 0x34d   :  { %p987_p11 = pnand %p985_p10, %p982_p9 }
 0x34f   :  { %990 = shalt.err (!%p987_p11)
}
 0x350   :  { %572 = dma.vmem_to_hbm [thread:$0]  %s570_s6, 128, %s1183_s9, [#allocation5]  }
 0x351   :  { %997 = dma.done.wait [#allocation5], 128  }
 0x352   :  { %998 = vsyncadd [#allocation5], 4294967168 }
 0x353   :  { %576 = vsyncpa [#allocation4], 1 }
 0x354   :  { %577 = vsyncpa [#allocation7], 1 }
 0x355   :  { %578 = vsyncpa [#allocation10], 1 }
 0x356   :  { %579 = vsyncpa [#allocation5], 1 }

</bundles_post_ra>
